<compile_context>
chip_gen: v5e
topology: v5e:2x2
jax: 0.10.0
libtpu: 0.0.40
codegen_flags: <defaults>
</compile_context>

<pallas_src>
import jax
import jax.numpy as jnp
from jax.experimental import pallas as pl
from jax.experimental.pallas import tpu as pltpu


def _round_up(x, m):
    return ((x + m - 1) // m) * m


def _generator_stub_kernel(z_ref, w_ref, b_ref, y_ref):
    # z_ref: (B_pad, K_pad) bf16, w_ref: (K_pad, tn) bf16, b_ref: (1, tn) f32
    # MXU matmul with f32 accumulation; bias + tanh stay in f32 (VPU/EUP).
    acc = jnp.dot(z_ref[...], w_ref[...], preferred_element_type=jnp.float32)
    acc = acc + b_ref[...]                     # (B_pad, tn) + (1, tn) broadcast
    y_ref[...] = jnp.tanh(acc).astype(y_ref.dtype)


def generator_stub(z, w, b, *, tn_cap=512):
    """z: (B, Z) f32, w: (Z, D) f32, b: (1, D) f32 -> (B, D) f32.

    Matmul runs in bf16 on the MXU with f32 accumulation; M/K/D are padded to
    TPU-friendly granularity and the result is sliced back to (B, D).
    """
    B, Z = z.shape
    Zw, D = w.shape
    assert Zw == Z and b.shape == (1, D)

    # Pad batch to a full sublane group, K and D to full lane multiples.
    B_pad = max(8, _round_up(B, 8))
    K_pad = max(128, _round_up(Z, 128))
    D_pad = max(128, _round_up(D, 128))

    # Lane-dense output tile: multiple of 128 that divides D_pad, capped.
    tn = min(D_pad, _round_up(tn_cap, 128))
    while D_pad % tn != 0:
        tn -= 128
    grid_n = D_pad // tn

    # Zero-padding is exact: padded K columns/rows contribute 0 to the matmul.
    z_p = jnp.zeros((B_pad, K_pad), jnp.bfloat16).at[:B, :Z].set(
        z.astype(jnp.bfloat16))
    w_p = jnp.zeros((K_pad, D_pad), jnp.bfloat16).at[:Z, :D].set(
        w.astype(jnp.bfloat16))
    b_p = jnp.zeros((1, D_pad), jnp.float32).at[:, :D].set(
        b.astype(jnp.float32))

    y_p = pl.pallas_call(
        _generator_stub_kernel,
        out_shape=jax.ShapeDtypeStruct((B_pad, D_pad), jnp.float32),
        grid=(grid_n,),
        in_specs=[
            pl.BlockSpec((B_pad, K_pad), lambda j: (0, 0)),   # z: same tile ∀ j
            pl.BlockSpec((K_pad, tn), lambda j: (0, j)),      # W: column slab j
            pl.BlockSpec((1, tn), lambda j: (0, j)),          # bias slab j
        ],
        out_specs=pl.BlockSpec((B_pad, tn), lambda j: (0, j)),
        compiler_params=pltpu.CompilerParams(
            dimension_semantics=("parallel",)),               # independent D tiles
    )(z_p, w_p, b_p)

    return y_p[:B, :D]


class Network:
    """JAX mirror of the PyTorch Network wrapper."""

    def __init__(self, latent_dim=32, out_channels=4, spatial=16, seed=0):
        self.latent_dim = latent_dim
        self.out_channels = out_channels
        self.spatial = spatial
        d = out_channels * spatial * spatial
        # Deterministic synthetic parameters (no checkpoint load).
        kw, kb = jax.random.split(jax.random.PRNGKey(seed))
        self.w = (jax.random.normal(kw, (latent_dim, d), jnp.float32)
                  / jnp.sqrt(jnp.float32(latent_dim)))
        self.b = 0.01 * jax.random.normal(kb, (1, d), jnp.float32)

    def forward(self):
        # Exact semantics of the reference module (forward is not implemented).
        raise NotImplementedError()

    def generator_forward(self, z):
        """Stand-in for self.generator(...): latent -> NCHW feature map."""
        y = generator_stub(z, self.w, self.b)                 # (B, C*H*W)
        B = z.shape[0]
        return y.reshape(B, self.out_channels, self.spatial, self.spatial)

    # Mode / checkpoint plumbing: no kernel equivalent, kept as no-ops.
    def _train(self):
        pass

    def _test(self):
        pass

    def _save(self, reason=''):
        pass  # TODO(synk): checkpoint save has no Pallas equivalent.

    def _load(self, reason=''):
        pass  # TODO(synk): checkpoint load has no Pallas equivalent.


if __name__ == "__main__":
    key = jax.random.PRNGKey(0)
    B, Z, C, S = 2, 32, 4, 16
    net = Network(latent_dim=Z, out_channels=C, spatial=S, seed=0)

    # Network.forward must raise, exactly like the PyTorch module.
    try:
        net.forward()
        raise SystemExit("expected NotImplementedError")
    except NotImplementedError:
        pass

    z = jax.random.normal(key, (B, Z), jnp.float32)
    out = net.generator_forward(z)            # (2, 4, 16, 16) NCHW
    jax.block_until_ready(out)
    assert out.shape == (B, C, S, S)

    # Reference with the same bf16 input rounding (accumulation stays f32).
    z_b = z.astype(jnp.bfloat16).astype(jnp.float32)
    w_b = net.w.astype(jnp.bfloat16).astype(jnp.float32)
    ref_b = jnp.tanh(z_b @ w_b + net.b).reshape(B, C, S, S)
    assert jnp.max(jnp.abs(out - ref_b)) < 2e-3

    # Sanity vs the full-f32 reference (bf16 input rounding only).
    ref_f32 = jnp.tanh(z @ net.w + net.b).reshape(B, C, S, S)
    assert jnp.max(jnp.abs(out - ref_f32)) < 5e-2

    print("KERNEL_OK")
</pallas_src>

<mosaic_0001>
module attributes {stable_mosaic.version = 11 : i64} {
  func.func @_generator_stub_kernel(%arg0: i32, %arg1: memref<8x128xbf16, #tpu.memory_space<vmem>>, %arg2: memref<128x512xbf16, #tpu.memory_space<vmem>>, %arg3: memref<1x512xf32, #tpu.memory_space<vmem>>, %arg4: memref<8x512xf32, #tpu.memory_space<vmem>>) attributes {dimension_semantics = [#tpu.dimension_semantics<parallel>], iteration_bounds = array<i64: 2>, scalar_prefetch = 0 : i64, scratch_operands = 0 : i64, tpu.core_type = #tpu.core_type<tc>, window_params = [{pipeline_mode = #tpu.pipeline_mode<synchronous>, transform_indices = @transform_0, window_bounds = array<i64: 8, 128>}, {transform_indices = @transform_1, window_bounds = array<i64: 128, 512>}, {transform_indices = @transform_2, window_bounds = array<i64: 1, 512>}, {transform_indices = @transform_3, window_bounds = array<i64: 8, 512>}]} {
    %c0 = arith.constant 0 : index
    %c0_0 = arith.constant 0 : index
    %0 = vector.load %arg1[%c0, %c0_0] : memref<8x128xbf16, #tpu.memory_space<vmem>>, vector<8x128xbf16>
    %c0_1 = arith.constant 0 : index
    %c0_2 = arith.constant 0 : index
    %1 = vector.load %arg2[%c0_1, %c0_2] : memref<128x512xbf16, #tpu.memory_space<vmem>>, vector<128x512xbf16>
    %cst = arith.constant dense<0.000000e+00> : vector<8x512xf32>
    %2 = tpu.matmul %0, %1, %cst {dimension_numbers = #tpu.dot_dimension_numbers<[1], [0], [0], [1], [0, 0, 1, 1], [], []>} : vector<8x128xbf16>, vector<128x512xbf16>, vector<8x512xf32> -> vector<8x512xf32>
    %c0_3 = arith.constant 0 : index
    %c0_4 = arith.constant 0 : index
    %3 = vector.load %arg3[%c0_3, %c0_4] : memref<1x512xf32, #tpu.memory_space<vmem>>, vector<1x512xf32>
    %4 = vector.broadcast %3 : vector<1x512xf32> to vector<8x512xf32>
    %5 = arith.addf %2, %4 : vector<8x512xf32>
    %6 = math.tanh %5 : vector<8x512xf32>
    %c0_5 = arith.constant 0 : index
    %c0_6 = arith.constant 0 : index
    %7 = vector.load %arg4[%c0_5, %c0_6] : memref<8x512xf32, #tpu.memory_space<vmem>>, vector<8x512xf32>
    tpu.vector_store %arg4[%c0_5, %c0_6], %6 {strides = array<i32>} : memref<8x512xf32, #tpu.memory_space<vmem>>, vector<8x512xf32>,
    return
  }
  func.func @transform_0(%arg0: i32) -> (i32, i32) {
    %c0_i32 = arith.constant 0 : i32
    %c0_i32_0 = arith.constant 0 : i32
    %c0_i32_1 = arith.constant 0 : i32
    return %c0_i32, %c0_i32_0 : i32, i32
  }
  func.func @transform_1(%arg0: i32) -> (i32, i32) {
    %c0_i32 = arith.constant 0 : i32
    %c0_i32_0 = arith.constant 0 : i32
    return %c0_i32, %arg0 : i32, i32
  }
  func.func @transform_2(%arg0: i32) -> (i32, i32) {
    %c0_i32 = arith.constant 0 : i32
    %c0_i32_0 = arith.constant 0 : i32
    return %c0_i32, %arg0 : i32, i32
  }
  func.func @transform_3(%arg0: i32) -> (i32, i32) {
    %c0_i32 = arith.constant 0 : i32
    %c0_i32_0 = arith.constant 0 : i32
    return %c0_i32, %arg0 : i32, i32
  }
}

</mosaic_0001>

<bundles_post_ra>
// kernel: tpu_custom_call.1
= control target key start
LH: loop header
LB: loop body
LE: loop exit
PB: predicated region body
PF: predicated region fallthrough
CT: control target
= control target key end

     0   :  { %s1306_s0 = inlined_call_operand.hbm [shape: bf16[8,128], index: 0, kind: input, shape index: {}]   ;;  %s1307_s1 = inlined_call_operand.hbm [shape: bf16[128,1024], index: 1, kind: input, shape index: {}]   ;;  %s1308_s2 = inlined_call_operand.hbm [shape: f32[1,1024], index: 2, kind: input, shape index: {}]   ;;  %s1309_s3 = inlined_call_operand.hbm [shape: f32[8,1024], index: 3, kind: output, shape index: {}]  }
   0x1   :  { %1310 = sst [smem:[#allocation12_spill]] %s1306_s0 }
   0x2   :  { %8 = vsyncpa [#allocation3], 0 }
   0x3   :  { %9 = vsyncpa [#allocation6], 0 }
   0x4   :  { %11 = vsyncpa [#allocation6 + $0x1], 0 }
   0x5   :  { %12 = vsyncpa [#allocation4], 0 }
   0x6   :  { %14 = vsyncpa [#allocation4 + $0x1], 0  ;;  %s1067_s12 = smov 0   ;;  %s1069_s13 = smov 0  }
   0x7   :  { %s1071_s14 = smov 0   ;;  %s1073_s15 = smov 0  }
   0x8 LB: > { %s1088_s16 = sadd.s32 1, %s1041_s15   ;;  %s48_s17 = sadd.s32 1, %s1037_s14  ;;  %s1041_s15 = sphi %s1073_s15, %s1321_s15   ;;  %s1037_s14 = sphi %s1071_s14, %s1320_s14   ;;  %s1033_s13 = sphi %s1069_s13, %s1319_s13   ;;  %s1029_s12 = sphi %s1067_s12, %s1318_s12  }
   0x9   : > { %s45_s18 = ssub.s32 %s1041_s15, %s1088_s16  ;;  %p55_p0 = scmp.ne.s32.totalorder %s1037_s14, %s1033_s13 }
   0xa   : > { %p46_p1 = scmp.eq.s32.totalorder %s45_s18, 0  ;;  %p56_p2 = scmp.eq.s32.totalorder %s1041_s15, 0 }
   0xb   : > { %p834_p4 = scmp.lt.s32.totalorder %s1041_s15, 2  ;;  %s149_s20 = sand.u32 1, %s1041_s15  }
   0xc   : > { %s1099_s19 = scalar_select %p46_p1, %s1037_s14, %s48_s17  }
   0xd   : > { %p57_p5 = por %p56_p2, %p55_p0  ;;  %s151_s21 = sand.u32 1, %s1037_s14  }
   0xe   : > { %s631_s22 = sshll.u32 %s151_s21, 8  ;;  %s774_s23 = sshll.u32 %s1041_s15, 4 }
   0xf   : > { %s158_s26 = scalar_lea.hbm %s1307_s1, %s774_s23  ;;  %s153_s28 = scalar_lea.vmem [#allocation5], %s631_s22 }
  0x10   : > { %s159_s27 = sshll.u32 %s158_s26, 4  ;;  %s161_s29 = sshll.u32 %s153_s28, 4  ;;  %s160_s27 = int_to_ptr.hbm [resolvable:$true] %s159_s27  ;;  %s162_s29 = int_to_ptr.vmem [resolvable:$true] %s161_s29 }
  0x11   : > { %p1114_p6 = pnand %p834_p4, %p57_p5  ;;  %s1118_s4 = scalar_lea.sflag [#allocation6], %s149_s20 }
  0x12   : > { %s881_s5 = sshra.s32 %s160_s27, 4  ;;  %s888_s9 = scalar_lea.hbm %s1307_s1, 512  ;;  %s882_s5 = int_to_ptr.hbm [resolvable:$true] %s881_s5 }
  0x13   : > { %s883_s6 = scalar_lea.hbm %s882_s5, 256  ;;  %p885_p8 = pneg %p1114_p6 }
  0x14   : > { %p884_p7 = scmp.ne.s32.totalorder %s882_s5, %s883_s6  ;;  %p889_p11 = scmp.lt.s32.totalorder %s882_s5, %s1307_s1 }
  0x15   : > { %p890_p12 = scmp.lt.s32.totalorder %s888_s9, %s883_s6 }
  0x16   : > { %p886_p9 = pnand %p885_p8, %p884_p7 }
  0x17   : > { %p891_p13 = por %p890_p12, %p889_p11 }
  0x18   : > { %p887_p10 = pneg %p886_p9 }
  0x1a   : > { %p892_p1 = pnand %p891_p13, %p887_p10 }
  0x1c   : > { %895 = shalt.err (!%p892_p1)
}
  0x1d   : > { %s1043_s17 = smov 512   ;;  %s1044_s18 = smov 256  }
  0x1e   : > { %s1045_s20 = smov 16   ;;  %s1135_s22 = sadd.s32 4294967295, %s1041_s15  }
  0x1f   : > { %825 = dma.hbm_to_vmem [thread:$0]  (!%p1114_p6), %s160_s27, 4096, %s162_s29, %s1118_s4, %s1043_s17, %s1044_s18, %s1045_s20  }
  0x20   : > { %s627_s23 = sadd.s32 4294967294, %s1041_s15   ;;  %p61_p2 = scmp.ne.s32.totalorder %s1033_s13, %s1029_s12 }
  0x21   : > { %p62_p4 = scmp.eq.s32.totalorder %s1135_s22, 0  ;;  %p111_p5 = scmp.eq.s32.totalorder %s1135_s22, 1 }
  0x22   : > { %p117_p7 = scmp.eq.s32.totalorder %s627_s23, 1  ;;  %p628_p9 = scmp.ge.s32.totalorder %s1041_s15, 1 }
  0x23   : > { %p1145_p10 = por %p62_p4, %p61_p2  ;;  %p1152_p11 = por %p111_p5, %p55_p0 }
  0x24   : > { %p1156_p12 = por %p117_p7, %p61_p2  ;;  %p124_p13 = scmp.lt.s32.totalorder %s1041_s15, 3 }
  0x25   : > { %s1315_s0 = sld [smem:[#allocation12_spill]]  ;;  %s634_s6 = sshll.u32 %s151_s21, 2 }
  0x26   : > { %p1164_p1 = pnand %p628_p9, %p124_p13  ;;  %s1046_s7 = smov [#allocation2]  }
  0x27   : > { %s138_s8 = sshll.u32 %s1046_s7, 4  ;;  %s635_s9 = sshll.u32 %s1041_s15, 2  ;;  %s139_s8 = int_to_ptr.vmem [resolvable:$true] %s138_s8 }
  0x28   : > { %p818_p0 = pneg %p1164_p1  ;;  %s179_s17 = scalar_lea.hbm %s1308_s2, %s635_s9 }
  0x29   : > { %s175_s18 = scalar_lea.vmem [#allocation7], %s634_s6  ;;  %s181_s23 = sshll.u32 %s179_s17, 4  ;;  %s182_s23 = int_to_ptr.hbm [resolvable:$true] %s181_s23 }
  0x2a   : > { %p819_p2 = pnand %p818_p0, %p62_p4  ;;  %s183_s20 = sshll.u32 %s175_s18, 4  ;;  %s184_s20 = int_to_ptr.vmem [resolvable:$true] %s183_s20 }
  0x2b   : > { %s136_s29 = sshll.u32 %s1315_s0, 4  ;;  %s941_s21 = sshra.s32 %s182_s23, 4  ;;  %s137_s29 = int_to_ptr.hbm [resolvable:$true] %s136_s29  ;;  %s942_s21 = int_to_ptr.hbm [resolvable:$true] %s941_s21 }
  0x2c   : > { %821 = dma.hbm_to_vmem [thread:$0]  (!%p819_p2), %s137_s29, 64, %s139_s8, [#allocation3]  }
  0x2d   : > { %s943_s27 = scalar_lea.hbm %s942_s21, 4  ;;  %s948_s0 = scalar_lea.hbm %s1308_s2, 8 }
  0x2e   : > { %p944_p5 = scmp.ne.s32.totalorder %s942_s21, %s943_s27  ;;  %p949_p13 = scmp.lt.s32.totalorder %s942_s21, %s1308_s2 }
  0x2f   : > { %p950_p0 = scmp.lt.s32.totalorder %s948_s0, %s943_s27 }
  0x30   : > { %p946_p7 = pnand %p944_p5, %p885_p8 }
  0x31   : > { %p951_p2 = por %p950_p0, %p949_p13 }
  0x32   : > { %p947_p9 = pneg %p946_p7 }
  0x34   : > { %p952_p3 = pnand %p951_p2, %p947_p9 }
  0x36   : > { %955 = shalt.err (!%p952_p3)
}
  0x37   : > { %828 = dma.hbm_to_vmem [thread:$0]  (!%p1114_p6), %s182_s23, 64, %s184_s20, %s1118_s4  }
  0x38   : > { %192 = sbr.rel (%p1164_p1) target bundleno = 247 (0xf7), region = 32 }
  0x3d   : > { %1016 = dma.done.wait (%p62_p4), [#allocation3], 64  }
  0x3e   : > { %1018 = vsyncadd (%p62_p4), [#allocation3], 4294967232  ;;  %s199_s0 = sand.u32 1, %s1135_s22   ;;  %s1198_s29 = sand.u32 1, %s1033_s13  }
  0x3f   : > { %s638_s6 = sshll.u32 %s1198_s29, 8  ;;  %s200_s30 = scalar_lea.sflag [#allocation6], %s199_s0 }
  0x40   : > { %s1201_s8 = scalar_lea.vmem [#allocation5], %s638_s6 }
  0x41   : > { %1020 = dma.done.wait (%p1145_p10), %s200_s30, 4160  }
  0x42   : > { %1022 = vsyncadd (%p1145_p10), %s200_s30, 4294963136  ;;  %v755_v0 = vld [vmem:[%s1201_s8 + $0xe0] sm:$0xf]  ;;  %v805_v1 = vld [vmem:[%s1201_s8 + $0xec] sm:$0xf0]  ;;  %s639_s4 = sshll.u32 %s1198_s29, 2 }
  0x43   : > { %v803_v2 = vld [vmem:[%s1201_s8 + $0xe4] sm:$0xf]  ;;  %v756_v3 = vor.u32 %v805_v1, %v755_v0  ;;  %v757_v4 = vld [vmem:[%s1201_s8 + $0xf0] sm:$0xf0]  ;;  %v763_v5 = vld [vmem:[%s1201_s8 + $0xe8] sm:$0xf] }
  0x44   : > { %v806_v6 = vld [vmem:[%s1201_s8 + $0xf4] sm:$0xf0]  ;;  %v760_v7 = vor.u32 %v803_v2, %v757_v4  ;;  %v804_v9 = vld [vmem:[%s1201_s8 + $0xec] sm:$0xf]  ;;  %v765_v10 = vld [vmem:[%s1201_s8 + $0xf8] sm:$0xf0] }
  0x45   : > { %v764_v8 = vor.u32 %v806_v6, %v763_v5  ;;  %v739_v11 = vld [vmem:[%s1201_s8 + $0xc0] sm:$0xf]  ;;  %448 = vmatpush.bf16.msra.mxu0 %v756_v3  ;;  %v768_v12 = vor.u32 %v804_v9, %v765_v10  ;;  %v801_v13 = vld [vmem:[%s1201_s8 + $0xcc] sm:$0xf0]  ;;  %v799_v14 = vld [vmem:[%s1201_s8 + $0xc4] sm:$0xf] }
  0x46   : > { %v741_v15 = vld [vmem:[%s1201_s8 + $0xd0] sm:$0xf0]  ;;  %461 = vmatpush.bf16.msra.mxu1 %v760_v7  ;;  %v740_v16 = vor.u32 %v801_v13, %v739_v11  ;;  %v747_v18 = vld [vmem:[%s1201_s8 + $0xc8] sm:$0xf]  ;;  %v802_v19 = vld [vmem:[%s1201_s8 + $0xd4] sm:$0xf0] }
  0x47   : > { %474 = vmatpush.bf16.msra.mxu2 %v764_v8  ;;  %v744_v17 = vor.u32 %v799_v14, %v741_v15  ;;  %v800_v20 = vld [vmem:[%s1201_s8 + $0xcc] sm:$0xf]  ;;  %487 = vmatpush.bf16.msra.mxu3 %v768_v12  ;;  %v748_v21 = vor.u32 %v802_v19, %v747_v18  ;;  %v749_v22 = vld [vmem:[%s1201_s8 + $0xd8] sm:$0xf0]  ;;  %v723_v23 = vld [vmem:[%s1201_s8 + $0xa0] sm:$0xf] }
  0x48   : > { %v797_v24 = vld [vmem:[%s1201_s8 + $0xac] sm:$0xf0]  ;;  %v752_v25 = vor.u32 %v800_v20, %v749_v22  ;;  %v795_v26 = vld [vmem:[%s1201_s8 + $0xa4] sm:$0xf]  ;;  %v725_v27 = vld [vmem:[%s1201_s8 + $0xb0] sm:$0xf0] }
  0x49   : > { %v731_v28 = vld [vmem:[%s1201_s8 + $0xa8] sm:$0xf]  ;;  %449 = vmatpush.bf16.msra.mxu0 %v740_v16  ;;  %v724_v29 = vor.u32 %v797_v24, %v723_v23  ;;  %v798_v30 = vld [vmem:[%s1201_s8 + $0xb4] sm:$0xf0]  ;;  %v796_v31 = vld [vmem:[%s1201_s8 + $0xac] sm:$0xf]  ;;  %v728_v33 = vor.u32 %v795_v26, %v725_v27 }
  0x4a   : > { %v733_v32 = vld [vmem:[%s1201_s8 + $0xb8] sm:$0xf0]  ;;  %462 = vmatpush.bf16.msra.mxu1 %v744_v17  ;;  %v732_v34 = vor.u32 %v798_v30, %v731_v28  ;;  %v707_v35 = vld [vmem:[%s1201_s8 + $0x80] sm:$0xf]  ;;  %v793_v36 = vld [vmem:[%s1201_s8 + $0x8c] sm:$0xf0] }
  0x4b   : > { %475 = vmatpush.bf16.msra.mxu2 %v748_v21  ;;  %v791_v37 = vld [vmem:[%s1201_s8 + $0x84] sm:$0xf]  ;;  %488 = vmatpush.bf16.msra.mxu3 %v752_v25  ;;  %v736_v38 = vor.u32 %v796_v31, %v733_v32  ;;  %v709_v39 = vld [vmem:[%s1201_s8 + $0x90] sm:$0xf0]  ;;  %v715_v40 = vld [vmem:[%s1201_s8 + $0x88] sm:$0xf]  ;;  %v708_v44 = vor.u32 %v793_v36, %v707_v35 }
  0x4c   : > { %v794_v41 = vld [vmem:[%s1201_s8 + $0x94] sm:$0xf0]  ;;  %v792_v42 = vld [vmem:[%s1201_s8 + $0x8c] sm:$0xf]  ;;  %v717_v43 = vld [vmem:[%s1201_s8 + $0x98] sm:$0xf0]  ;;  %v712_v45 = vor.u32 %v791_v37, %v709_v39 }
  0x4d   : > { %450 = vmatpush.bf16.msra.mxu0 %v724_v29  ;;  %v716_v46 = vor.u32 %v794_v41, %v715_v40  ;;  %v691_v47 = vld [vmem:[%s1201_s8 + $0x60] sm:$0xf]  ;;  %v789_v48 = vld [vmem:[%s1201_s8 + $0x6c] sm:$0xf0]  ;;  %v787_v49 = vld [vmem:[%s1201_s8 + $0x64] sm:$0xf]  ;;  %v720_v50 = vor.u32 %v792_v42, %v717_v43 }
  0x4e   : > { %463 = vmatpush.bf16.msra.mxu1 %v728_v33  ;;  %v693_v51 = vld [vmem:[%s1201_s8 + $0x70] sm:$0xf0]  ;;  %v699_v52 = vld [vmem:[%s1201_s8 + $0x68] sm:$0xf]  ;;  %v790_v53 = vld [vmem:[%s1201_s8 + $0x74] sm:$0xf0]  ;;  %v692_v56 = vor.u32 %v789_v48, %v691_v47 }
  0x4f   : > { %476 = vmatpush.bf16.msra.mxu2 %v732_v34  ;;  %489 = vmatpush.bf16.msra.mxu3 %v736_v38  ;;  %v788_v54 = vld [vmem:[%s1201_s8 + $0x6c] sm:$0xf]  ;;  %v701_v55 = vld [vmem:[%s1201_s8 + $0x78] sm:$0xf0]  ;;  %v696_v57 = vor.u32 %v787_v49, %v693_v51  ;;  %v700_v58 = vor.u32 %v790_v53, %v699_v52  ;;  %v675_v59 = vld [vmem:[%s1201_s8 + $0x40] sm:$0xf] }
  0x50   : > { %v785_v60 = vld [vmem:[%s1201_s8 + $0x4c] sm:$0xf0]  ;;  %v783_v61 = vld [vmem:[%s1201_s8 + $0x44] sm:$0xf]  ;;  %v704_v62 = vor.u32 %v788_v54, %v701_v55  ;;  %v677_v63 = vld [vmem:[%s1201_s8 + $0x50] sm:$0xf0] }
  0x51   : > { %451 = vmatpush.bf16.msra.mxu0 %v708_v44  ;;  %v683_v0 = vld [vmem:[%s1201_s8 + $0x48] sm:$0xf]  ;;  %v786_v1 = vld [vmem:[%s1201_s8 + $0x54] sm:$0xf0]  ;;  %v784_v2 = vld [vmem:[%s1201_s8 + $0x4c] sm:$0xf]  ;;  %v676_v4 = vor.u32 %v785_v60, %v675_v59  ;;  %v680_v5 = vor.u32 %v783_v61, %v677_v63 }
  0x52   : > { %464 = vmatpush.bf16.msra.mxu1 %v712_v45  ;;  %v685_v3 = vld [vmem:[%s1201_s8 + $0x58] sm:$0xf0]  ;;  %v684_v6 = vor.u32 %v786_v1, %v683_v0  ;;  %v659_v7 = vld [vmem:[%s1201_s8 + $0x20] sm:$0xf]  ;;  %v781_v8 = vld [vmem:[%s1201_s8 + $0x2c] sm:$0xf0] }
  0x53   : > { %477 = vmatpush.bf16.msra.mxu2 %v716_v46  ;;  %490 = vmatpush.bf16.msra.mxu3 %v720_v50  ;;  %v779_v9 = vld [vmem:[%s1201_s8 + $0x24] sm:$0xf]  ;;  %v688_v10 = vor.u32 %v784_v2, %v685_v3  ;;  %v661_v11 = vld [vmem:[%s1201_s8 + $0x30] sm:$0xf0]  ;;  %v667_v12 = vld [vmem:[%s1201_s8 + $0x28] sm:$0xf]  ;;  %v660_v16 = vor.u32 %v781_v8, %v659_v7 }
  0x54   : > { %v782_v13 = vld [vmem:[%s1201_s8 + $0x34] sm:$0xf0]  ;;  %v780_v14 = vld [vmem:[%s1201_s8 + $0x2c] sm:$0xf]  ;;  %v669_v15 = vld [vmem:[%s1201_s8 + $0x38] sm:$0xf0]  ;;  %v664_v17 = vor.u32 %v779_v9, %v661_v11 }
  0x55   : > { %452 = vmatpush.bf16.msra.mxu0 %v692_v56  ;;  %v668_v18 = vor.u32 %v782_v13, %v667_v12  ;;  %v643_v19 = vld [vmem:[%s1201_s8] sm:$0xf]  ;;  %v777_v20 = vld [vmem:[%s1201_s8 + $0xc] sm:$0xf0]  ;;  %v775_v21 = vld [vmem:[%s1201_s8 + $0x4] sm:$0xf]  ;;  %v672_v22 = vor.u32 %v780_v14, %v669_v15 }
  0x56   : > { %465 = vmatpush.bf16.msra.mxu1 %v696_v57  ;;  %v645_v23 = vld [vmem:[%s1201_s8 + $0x10] sm:$0xf0]  ;;  %v651_v24 = vld [vmem:[%s1201_s8 + $0x8] sm:$0xf]  ;;  %v778_v25 = vld [vmem:[%s1201_s8 + $0x14] sm:$0xf0]  ;;  %v644_v28 = vor.u32 %v777_v20, %v643_v19 }
  0x57   : > { %478 = vmatpush.bf16.msra.mxu2 %v700_v58  ;;  %491 = vmatpush.bf16.msra.mxu3 %v704_v62  ;;  %v776_v26 = vld [vmem:[%s1201_s8 + $0xc] sm:$0xf]  ;;  %v653_v27 = vld [vmem:[%s1201_s8 + $0x18] sm:$0xf0]  ;;  %v648_v29 = vor.u32 %v775_v21, %v645_v23  ;;  %v652_v30 = vor.u32 %v778_v25, %v651_v24  ;;  %s213_s24 = scalar_lea.vmem [#allocation7], %s639_s4  ;;  %s640_s5 = sshll.u32 %s1198_s29, 5 }
  0x58   : > { %v656_v31 = vor.u32 %v776_v26, %v653_v27  ;;  %v245_v32 = vld [vmem:[#allocation2] sm:$0xf]  ;;  %v278_v33 = vld [vmem:[%s213_s24] sm:$0xf]  ;;  %s807_s11 = sshll.u32 %s1135_s22, 5  ;;  %s241_s17 = scalar_lea.vmem [#allocation8], %s640_s5 }
  0x59   : > { %453 = vmatpush.bf16.msra.mxu0 %v676_v4  ;;  %v280_v34 = vperm.slane %v278_v33, 0  ;;  %v281_v35 = vperm.slane %v278_v33, 1  ;;  %v282_v40 = vperm.slane %v278_v33, 2  ;;  %v283_v41 = vperm.slane %v278_v33, 3  ;;  %s520_s23 = scalar_lea.hbm %s1309_s3, %s807_s11  ;;  %s522_s21 = sshll.u32 %s241_s17, 4  ;;  %s523_s21 = int_to_ptr.vmem [resolvable:$true] %s522_s21 }
  0x5a   : > { %466 = vmatpush.bf16.msra.mxu1 %v680_v5  ;;  %s524_s22 = sshll.u32 %s520_s23, 4  ;;  %s509_s27 = scalar_lea.sflag [#allocation4], %s1198_s29  ;;  %s525_s22 = int_to_ptr.hbm [resolvable:$true] %s524_s22 }
  0x5b   : > { %479 = vmatpush.bf16.msra.mxu2 %v684_v6  ;;  %492 = vmatpush.bf16.msra.mxu3 %v688_v10  ;;  %s985_s28 = sshra.s32 %s525_s22, 4  ;;  %s991_s0 = scalar_lea.hbm %s1309_s3, 64  ;;  %s986_s28 = int_to_ptr.hbm [resolvable:$true] %s985_s28 }
  0x5c   : > { %s987_s7 = scalar_lea.hbm %s986_s28, 32  ;;  %p992_p4 = scmp.lt.s32.totalorder %s986_s28, %s1309_s3 }
  0x5d   : > { %454 = vmatpush.bf16.msra.mxu0 %v660_v16  ;;  %p988_p3 = scmp.ne.s32.totalorder %s986_s28, %s987_s7  ;;  %p993_p10 = scmp.lt.s32.totalorder %s991_s0, %s987_s7 }
  0x5e   : > { %467 = vmatpush.bf16.msra.mxu1 %v664_v17 }
  0x5f   : > { %480 = vmatpush.bf16.msra.mxu2 %v668_v18  ;;  %493 = vmatpush.bf16.msra.mxu3 %v672_v22  ;;  %p989_p6 = pnand %p988_p3, %p1152_p11  ;;  %p994_p1 = por %p993_p10, %p992_p4 }
  0x61   : > { %455 = vmatpush.bf16.msra.mxu0 %v644_v28  ;;  %p990_p8 = pneg %p989_p6 }
  0x62   : > { %468 = vmatpush.bf16.msra.mxu1 %v648_v29 }
  0x63   : > { %481 = vmatpush.bf16.msra.mxu2 %v652_v30  ;;  %494 = vmatpush.bf16.msra.mxu3 %v656_v31  ;;  %p995_p5 = pnand %p994_p1, %p990_p8 }
  0x64   : > { %456 = vmatmul.bf16.vlgmr.msra.gmra.mxu0 %v245_v32 }
  0x65   : > { %469 = vmatmul.bf16.vlgmr.msra.gmra.mxu1 %v245_v32 }
  0x66   : > { %482 = vmatmul.bf16.vlgmr.msra.gmra.mxu2 %v245_v32  ;;  %495 = vmatmul.bf16.vlgmr.msra.gmra.mxu3 %v245_v32 }
  0xe1   : > { %v457_v36 = vpop.f32.mrf.mxu0 }
  0xe2   : > { %v458_v37 = vadd.f32 %v457_v36, %v280_v34  ;;  %v470_v38 = vpop.f32.mrf.mxu1 }
  0xe3   : > { %v471_v39 = vadd.f32 %v470_v38, %v281_v35 }
  0xe4   : > { %873 = vtanh.f32 %v458_v37 }
  0xe5   : > { %875 = vtanh.f32 %v471_v39 }
  0xe9   : > { %v483_v42 = vpop.f32.mrf.mxu2  ;;  %v496_v44 = vpop.f32.mrf.mxu3 }
  0xea   : > { %v484_v43 = vadd.f32 %v483_v42, %v282_v40  ;;  %v459_v45 = vpop.f32.mrf.mxu0  ;;  %v874_v46 = vpop.eup %873  ;;  %v497_v47 = vadd.f32 %v496_v44, %v283_v41 }
  0xeb   : > { %v472_v48 = vpop.f32.mrf.mxu1  ;;  %v876_v49 = vpop.eup %875  ;;  %504 = vst [vmem:[%s241_s17] sm:$0xff] %v874_v46 }
  0xec   : > { %877 = vtanh.f32 %v484_v43  ;;  %505 = vst [vmem:[%s241_s17 + $0x8] sm:$0xff] %v876_v49 }
  0xed   : > { %879 = vtanh.f32 %v497_v47 }
  0xf1   : > { %v485_v50 = vpop.f32.mrf.mxu2  ;;  %v498_v52 = vpop.f32.mrf.mxu3 }
  0xf2   : > { %v878_v51 = vpop.eup %877 }
  0xf3   : > { %v880_v53 = vpop.eup %879  ;;  %506 = vst [vmem:[%s241_s17 + $0x10] sm:$0xff] %v878_v51 }
  0xf4   : > { %507 = vst [vmem:[%s241_s17 + $0x18] sm:$0xff] %v880_v53 }
  0xf5   : > { %998 = shalt.err (!%p995_p5)
}
  0xf6   : > { %816 = dma.vmem_to_hbm [thread:$0]  (%p1152_p11), %s523_s21, 512, %s525_s22, %s509_s27  }
  0xf7 PF: > { %s536_s29 = sand.u32 1, %s1029_s12   ;;  %p1317_p7 = scmp.ge.s32.totalorder %s1041_s15, 2 }
  0xf8   : > { %s537_s8 = scalar_lea.sflag [#allocation4], %s536_s29 }
  0xf9   : > { %p830_p9 = pnand %p1317_p7, %p1156_p12 }
  0xfb   : > { %p831_p13 = pneg %p830_p9 }
  0xfd   : > { %1024 = dma.done.wait (%p831_p13), %s537_s8, 512  }
  0xfe   : > { %1026 = vsyncadd (%p831_p13), %s537_s8, 4294966784  ;;  %p17_p0 = scmp.ge.s32.totalorder %s1088_s16, 4   ;;  %s1318_s12 = smov %s1033_s13 }
  0xff   : > { %s1319_s13 = smov %s1037_s14  ;;  %s1320_s14 = smov %s1099_s19 }
 0x100   : > { %s1321_s15 = smov %s1088_s16  ;;  %19 = sbr.rel (!%p17_p0) target bundleno = 8 (0x8), region = 93 }
 0x105   :  { %543 = vsyncpa [#allocation3], 1 }
 0x106   :  { %545 = vsyncpa [#allocation3 + $0x1], 1 }
 0x107   :  { %546 = vsyncpa [#allocation6], 1 }
 0x108   :  { %548 = vsyncpa [#allocation6 + $0x1], 1 }
 0x109   :  { %549 = vsyncpa [#allocation4], 1 }
 0x10a   :  { %551 = vsyncpa [#allocation4 + $0x1], 1 }

</bundles_post_ra>
